<compile_context>
chip_gen: v7x
topology: tpu7x:2x2x1
jax: 0.10.0
libtpu: 0.0.40
codegen_flags: <defaults>
</compile_context>

<pallas_src>
import math

import jax
import jax.numpy as jnp
from jax.experimental import pallas as pl
from jax.experimental.pallas import tpu as pltpu

_LANES = 128


def _round_up(x, m):
    return ((x + m - 1) // m) * m


def _pick_batch_tile(B, block_batch):
    """Rows of the batch processed per grid step."""
    # Small batch: one full-array block (block == full dims is always legal).
    if B < 2 * _LANES:
        return B
    # Larger batches: lane-aligned tiles, capped so there are at least two grid
    # steps (both v7x TensorCores get work) and at most `block_batch` rows per
    # step (amortizes the ~0.35us/step overhead; working set stays a few MiB,
    # far under scoped VMEM on every generation).
    return min(block_batch, _round_up(pl.cdiv(B, 2), _LANES))


def _critic_kernel(x_ref, w1t_ref, b1_ref, w2t_ref, b2_ref, w3_ref, b3_ref, o_ref):
    # In-kernel cast of the f32 state tile (cheap VPU pack; avoids a separate
    # wrapper-side HBM cast pass in front of a DMA/overhead-bound kernel).
    x = x_ref[...].astype(w1t_ref.dtype)                       # (TB, S)

    # Layer 1, transposed ("batch on lanes"): contract the state's feature dim
    # against w1^T's feature dim -> (H, TB).  Transposed-RHS contraction is the
    # native q@k^T MXU form, so the state is never physically transposed.
    h1 = jax.lax.dot_general(
        w1t_ref[...], x,
        dimension_numbers=(((1,), (1,)), ((), ())),
        preferred_element_type=jnp.float32)                    # (H, TB) f32
    h1 = jnp.maximum(h1 + b1_ref[...], 0.0)

    # Layer 2: (H, H) @ (H, TB) -> (H, TB), f32 accumulation on the MXU.
    h2 = jnp.dot(w2t_ref[...], h1.astype(w2t_ref.dtype),
                 preferred_element_type=jnp.float32)
    h2 = jnp.maximum(h2 + b2_ref[...], 0.0)

    # Layer 3 (output width 1): skip the MXU -- VPU multiply + sublane reduce
    # over H.  The result stays lane-major, so the (1, TB) store is lane-dense
    # (no per-step relayout, single unmasked-ish store per step).
    v = jnp.sum(h2 * w3_ref[...], axis=0, keepdims=True) + b3_ref[0]
    o_ref[...] = v.astype(o_ref.dtype)


def a2c_critic_forward(state, params, *, block_batch=4096, use_bf16=True):
    """V(s) = critic MLP(state), computed by a batch-tiled Pallas kernel."""
    w1, b1, w2, b2, w3, b3 = params
    B, S = state.shape
    H = w1.shape[1]

    state = state.astype(jnp.float32)   # no-op when already f32
    compute_dtype = jnp.bfloat16 if use_bf16 else jnp.float32
    # Tiny one-time weight reshapes/casts (a few KiB; negligible HBM traffic).
    w1t = jnp.transpose(w1).astype(compute_dtype)        # (H, S)
    w2t = jnp.transpose(w2).astype(compute_dtype)        # (H, H)  (out, in)
    b1c = b1.reshape(H, 1).astype(jnp.float32)
    b2c = b2.reshape(H, 1).astype(jnp.float32)
    w3c = w3.reshape(H, 1).astype(jnp.float32)           # column for the VPU reduce
    b3s = b3.reshape(1).astype(jnp.float32)              # scalar, lives in SMEM

    TB = _pick_batch_tile(B, block_batch)
    grid = (pl.cdiv(B, TB),)   # ragged tail handled by a partial last block

    cost = pl.CostEstimate(
        flops=2 * B * (S * H + H * H + H),
        transcendentals=0,
        bytes_accessed=(B * S * 4                          # f32 state read
                        + B * 4                            # f32 value write
                        + w1t.size * w1t.dtype.itemsize
                        + w2t.size * w2t.dtype.itemsize
                        + (b1c.size + b2c.size + w3c.size + b3s.size) * 4))

    out = pl.pallas_call(
        _critic_kernel,
        out_shape=jax.ShapeDtypeStruct((1, B), jnp.float32),
        grid=grid,
        in_specs=[
            # State tile, pipelined over the batch grid axis (DMA'd as f32; the
            # bf16 cast happens in-kernel).  On v7x, if the DMA is still
            # exposed after enlarging TB, add `pipeline_mode=pl.Buffered(3)`.
            pl.BlockSpec((TB, S), lambda i: (i, 0)),
            pl.BlockSpec((H, S), lambda i: (0, 0)),        # w1^T (VMEM resident)
            pl.BlockSpec((H, 1), lambda i: (0, 0)),        # b1
            pl.BlockSpec((H, H), lambda i: (0, 0)),        # w2^T
            pl.BlockSpec((H, 1), lambda i: (0, 0)),        # b2
            pl.BlockSpec((H, 1), lambda i: (0, 0)),        # w3 column
            pl.BlockSpec(memory_space=pltpu.MemorySpace.SMEM),  # b3 scalar
        ],
        out_specs=pl.BlockSpec((1, TB), lambda i: (0, i)),
        compiler_params=pltpu.CompilerParams(
            dimension_semantics=("parallel",)),
        cost_estimate=cost,
    )(state, w1t, b1c, w2t, b2c, w3c, b3s)

    return out.reshape(B, 1)


def kaiming_uniform(key, fan_in, shape, dtype=jnp.float32):
    # PyTorch nn.init.kaiming_uniform_(nonlinearity='relu'):
    # bound = sqrt(2) * sqrt(3 / fan_in) = sqrt(6 / fan_in)
    bound = math.sqrt(6.0 / fan_in)
    return jax.random.uniform(key, shape, dtype=dtype, minval=-bound, maxval=bound)


def init_critic_params(key, state_dim, hidden_dim):
    k1, k2, k3 = jax.random.split(key, 3)
    # Weights stored (in, out) (transposed vs PyTorch) so y = x @ W + b;
    # fan_in == in_features matches PyTorch; biases zero per init_weights().
    w1 = kaiming_uniform(k1, state_dim, (state_dim, hidden_dim))
    b1 = jnp.zeros((hidden_dim,), jnp.float32)
    w2 = kaiming_uniform(k2, hidden_dim, (hidden_dim, hidden_dim))
    b2 = jnp.zeros((hidden_dim,), jnp.float32)
    w3 = kaiming_uniform(k3, hidden_dim, (hidden_dim, 1))
    b3 = jnp.zeros((1,), jnp.float32)
    return (w1, b1, w2, b2, w3, b3)


def reference_forward(state, params, match_bf16=True):
    w1, b1, w2, b2, w3, b3 = params
    if match_bf16:
        h1 = jnp.dot(state.astype(jnp.bfloat16), w1.astype(jnp.bfloat16),
                     preferred_element_type=jnp.float32) + b1
        h1 = jnp.maximum(h1, 0.0)
        h2 = jnp.dot(h1.astype(jnp.bfloat16), w2.astype(jnp.bfloat16),
                     preferred_element_type=jnp.float32) + b2
        h2 = jnp.maximum(h2, 0.0)
    else:
        h1 = jnp.maximum(state @ w1 + b1, 0.0)
        h2 = jnp.maximum(h1 @ w2 + b2, 0.0)
    return h2 @ w3 + b3


if __name__ == "__main__":
    key = jax.random.PRNGKey(0)
    k_param, k_state, k_state2 = jax.random.split(key, 3)

    batch, state_dim, hidden_dim = 4, 8, 32
    params = init_critic_params(k_param, state_dim, hidden_dim)
    state = jax.random.normal(k_state, (batch, state_dim), dtype=jnp.float32)

    out = jax.block_until_ready(a2c_critic_forward(state, params))
    assert out.shape == (batch, 1)
    # Tight match vs a reference with the same bf16-operand / f32-accum math.
    ref_bf16 = reference_forward(state, params, match_bf16=True)
    assert jnp.allclose(out, ref_bf16, atol=1e-4, rtol=1e-4)
    # Loose match vs the pure-f32 PyTorch-equivalent forward.
    ref_f32 = reference_forward(state, params, match_bf16=False)
    assert jnp.allclose(out, ref_f32, atol=5e-2, rtol=5e-2)

    # Multi-block grid with a ragged (partial) last block -- no padding pass.
    big_batch = 300
    big_state = jax.random.normal(k_state2, (big_batch, state_dim), dtype=jnp.float32)
    big_out = jax.block_until_ready(a2c_critic_forward(big_state, params))
    assert big_out.shape == (big_batch, 1)
    big_ref = reference_forward(big_state, params, match_bf16=True)
    assert jnp.allclose(big_out, big_ref, atol=1e-4, rtol=1e-4)

    print("KERNEL_OK")
</pallas_src>

<mosaic_0001>
module attributes {stable_mosaic.version = 11 : i64} {
  func.func @_critic_kernel(%arg0: i32, %arg1: memref<4x8xf32, #tpu.memory_space<vmem>>, %arg2: memref<32x8xbf16, #tpu.memory_space<vmem>>, %arg3: memref<32x1xf32, #tpu.memory_space<vmem>>, %arg4: memref<32x32xbf16, #tpu.memory_space<vmem>>, %arg5: memref<32x1xf32, #tpu.memory_space<vmem>>, %arg6: memref<32x1xf32, #tpu.memory_space<vmem>>, %arg7: memref<1xf32, #tpu.memory_space<smem>>, %arg8: memref<1x4xf32, #tpu.memory_space<vmem>>) attributes {dimension_semantics = [#tpu.dimension_semantics<parallel>], iteration_bounds = array<i64: 1>, scalar_prefetch = 0 : i64, scratch_operands = 0 : i64, tpu.core_type = #tpu.core_type<tc>, window_params = [{transform_indices = @transform_0, window_bounds = array<i64: 4, 8>}, {pipeline_mode = #tpu.pipeline_mode<synchronous>, transform_indices = @transform_1, window_bounds = array<i64: 32, 8>}, {pipeline_mode = #tpu.pipeline_mode<synchronous>, transform_indices = @transform_2, window_bounds = array<i64: 32, 1>}, {pipeline_mode = #tpu.pipeline_mode<synchronous>, transform_indices = @transform_3, window_bounds = array<i64: 32, 32>}, {pipeline_mode = #tpu.pipeline_mode<synchronous>, transform_indices = @transform_4, window_bounds = array<i64: 32, 1>}, {pipeline_mode = #tpu.pipeline_mode<synchronous>, transform_indices = @transform_5, window_bounds = array<i64: 32, 1>}, {transform_indices = @transform_6, window_bounds = array<i64: 1>}, {transform_indices = @transform_7, window_bounds = array<i64: 1, 4>}]} {
    %c0 = arith.constant 0 : index
    %c0_0 = arith.constant 0 : index
    %0 = vector.load %arg1[%c0, %c0_0] : memref<4x8xf32, #tpu.memory_space<vmem>>, vector<4x8xf32>
    %1 = arith.truncf %0 : vector<4x8xf32> to vector<4x8xbf16>
    %c0_1 = arith.constant 0 : index
    %c0_2 = arith.constant 0 : index
    %2 = vector.load %arg2[%c0_1, %c0_2] : memref<32x8xbf16, #tpu.memory_space<vmem>>, vector<32x8xbf16>
    %cst = arith.constant dense<0.000000e+00> : vector<32x4xf32>
    %3 = tpu.matmul %2, %1, %cst {dimension_numbers = #tpu.dot_dimension_numbers<[1], [1], [0], [0], [0, 0, 1, 0], [], []>} : vector<32x8xbf16>, vector<4x8xbf16>, vector<32x4xf32> -> vector<32x4xf32>
    %c0_3 = arith.constant 0 : index
    %c0_4 = arith.constant 0 : index
    %4 = vector.load %arg3[%c0_3, %c0_4] : memref<32x1xf32, #tpu.memory_space<vmem>>, vector<32x1xf32>
    %5 = vector.broadcast %4 : vector<32x1xf32> to vector<32x4xf32>
    %6 = arith.addf %3, %5 : vector<32x4xf32>
    %cst_5 = arith.constant 0.000000e+00 : f32
    %7 = vector.broadcast %cst_5 : f32 to vector<32x4xf32>
    %8 = arith.maximumf %6, %7 : vector<32x4xf32>
    %c0_6 = arith.constant 0 : index
    %c0_7 = arith.constant 0 : index
    %9 = vector.load %arg4[%c0_6, %c0_7] : memref<32x32xbf16, #tpu.memory_space<vmem>>, vector<32x32xbf16>
    %10 = arith.truncf %8 : vector<32x4xf32> to vector<32x4xbf16>
    %cst_8 = arith.constant dense<0.000000e+00> : vector<32x4xf32>
    %11 = tpu.matmul %9, %10, %cst_8 {dimension_numbers = #tpu.dot_dimension_numbers<[1], [0], [0], [1], [0, 0, 1, 1], [], []>} : vector<32x32xbf16>, vector<32x4xbf16>, vector<32x4xf32> -> vector<32x4xf32>
    %c0_9 = arith.constant 0 : index
    %c0_10 = arith.constant 0 : index
    %12 = vector.load %arg5[%c0_9, %c0_10] : memref<32x1xf32, #tpu.memory_space<vmem>>, vector<32x1xf32>
    %13 = vector.broadcast %12 : vector<32x1xf32> to vector<32x4xf32>
    %14 = arith.addf %11, %13 : vector<32x4xf32>
    %cst_11 = arith.constant 0.000000e+00 : f32
    %15 = vector.broadcast %cst_11 : f32 to vector<32x4xf32>
    %16 = arith.maximumf %14, %15 : vector<32x4xf32>
    %c0_12 = arith.constant 0 : index
    %c0_13 = arith.constant 0 : index
    %17 = vector.load %arg6[%c0_12, %c0_13] : memref<32x1xf32, #tpu.memory_space<vmem>>, vector<32x1xf32>
    %18 = vector.broadcast %17 : vector<32x1xf32> to vector<32x4xf32>
    %19 = arith.mulf %16, %18 : vector<32x4xf32>
    %cst_14 = arith.constant dense<0.000000e+00> : vector<4xf32>
    %20 = vector.multi_reduction <add>, %19, %cst_14 [0] : vector<32x4xf32> to vector<4xf32>
    %21 = vector.shape_cast %20 : vector<4xf32> to vector<1x4xf32>
    %c0_15 = arith.constant 0 : index
    %22 = memref.load %arg7[%c0_15] : memref<1xf32, #tpu.memory_space<smem>>
    %23 = vector.broadcast %22 : f32 to vector<1x4xf32>
    %24 = arith.addf %21, %23 : vector<1x4xf32>
    %c0_16 = arith.constant 0 : index
    %c0_17 = arith.constant 0 : index
    %25 = vector.load %arg8[%c0_16, %c0_17] : memref<1x4xf32, #tpu.memory_space<vmem>>, vector<1x4xf32>
    tpu.vector_store %arg8[%c0_16, %c0_17], %24 {strides = array<i32>} : memref<1x4xf32, #tpu.memory_space<vmem>>, vector<1x4xf32>,
    return
  }
  func.func @transform_0(%arg0: i32) -> (i32, i32) {
    %c0_i32 = arith.constant 0 : i32
    %c0_i32_0 = arith.constant 0 : i32
    return %arg0, %c0_i32 : i32, i32
  }
  func.func @transform_1(%arg0: i32) -> (i32, i32) {
    %c0_i32 = arith.constant 0 : i32
    %c0_i32_0 = arith.constant 0 : i32
    %c0_i32_1 = arith.constant 0 : i32
    return %c0_i32, %c0_i32_0 : i32, i32
  }
  func.func @transform_2(%arg0: i32) -> (i32, i32) {
    %c0_i32 = arith.constant 0 : i32
    %c0_i32_0 = arith.constant 0 : i32
    %c0_i32_1 = arith.constant 0 : i32
    return %c0_i32, %c0_i32_0 : i32, i32
  }
  func.func @transform_3(%arg0: i32) -> (i32, i32) {
    %c0_i32 = arith.constant 0 : i32
    %c0_i32_0 = arith.constant 0 : i32
    %c0_i32_1 = arith.constant 0 : i32
    return %c0_i32, %c0_i32_0 : i32, i32
  }
  func.func @transform_4(%arg0: i32) -> (i32, i32) {
    %c0_i32 = arith.constant 0 : i32
    %c0_i32_0 = arith.constant 0 : i32
    %c0_i32_1 = arith.constant 0 : i32
    return %c0_i32, %c0_i32_0 : i32, i32
  }
  func.func @transform_5(%arg0: i32) -> (i32, i32) {
    %c0_i32 = arith.constant 0 : i32
    %c0_i32_0 = arith.constant 0 : i32
    %c0_i32_1 = arith.constant 0 : i32
    return %c0_i32, %c0_i32_0 : i32, i32
  }
  func.func @transform_6(%arg0: i32) -> i32 {
    %c0_i32 = arith.constant 0 : i32
    %c0_i32_0 = arith.constant 0 : i32
    return %c0_i32 : i32
  }
  func.func @transform_7(%arg0: i32) -> (i32, i32) {
    %c0_i32 = arith.constant 0 : i32
    %c0_i32_0 = arith.constant 0 : i32
    return %c0_i32, %arg0 : i32, i32
  }
}

</mosaic_0001>

<bundles_post_ra>
// kernel: tpu_custom_call.1
= control target key start
LH: loop header
LB: loop body
LE: loop exit
PB: predicated region body
PF: predicated region fallthrough
CT: control target
= control target key end

     0   :  { %vm69_vm0 = vcmask 64512   ;;  %v355_v5 = vmov 0   ;;  %s469_s0 = inlined_call_operand.vmem [shape: f32[4,8], index: 0, kind: input, shape index: {}]   ;;  %s470_s1 = inlined_call_operand.vmem [shape: bf16[32,8], index: 1, kind: input, shape index: {}]   ;;  %s471_s2 = inlined_call_operand.vmem [shape: f32[32,1], index: 2, kind: input, shape index: {}]   ;;  %s472_s3 = inlined_call_operand.vmem [shape: bf16[32,32], index: 3, kind: input, shape index: {}]   ;;  %s473_s4 = inlined_call_operand.vmem [shape: f32[32,1], index: 4, kind: input, shape index: {}]   ;;  %s474_s5 = inlined_call_operand.vmem [shape: f32[32,1], index: 5, kind: input, shape index: {}]   ;;  %s475_s6 = inlined_call_operand.<no memory space> [shape: f32[1], index: 6, kind: input, shape index: {}]   ;;  %s476_s7 = inlined_call_operand.hbm [shape: f32[1,4], index: 7, kind: output, shape index: {}]  }
   0x1   :  { %v29_v0 = vld [vmem:[%s469_s0] sm:$0xf]  ;;  %325 = vset.pattern.permute.xlu0 %v355_v5  ;;  %v37_v6 = vld [vmem:[%s471_s2 + $0x10] sm:$0xff]  ;;  %v328_v7 = vld [vmem:[%s470_s1 + $0x8] sm:$0xff]   ;;  %326 = vset.pattern.permute.xlu1 %v355_v5 }
   0x2   :  { %v327_v1 = vld [vmem:[%s470_s1] sm:$0xff]   ;;  %v30_v2 = vpack.c.bf16 %v29_v0, %v29_v0  ;;  %v36_v8 = vld [vmem:[%s471_s2 + $0x8] sm:$0xff]  ;;  %51 = vperm.xlu1 %326, %v37_v6   ;;  %v38_v9 = vld [vmem:[%s471_s2 + $0x18] sm:$0xff] }
   0x3   :  { %310 = vmatprep.mubr.msk.bf16.mxu0 %vm69_vm0, %v327_v1  ;;  %v35_v3 = vld [vmem:[%s471_s2] sm:$0xff] }
   0x4   :  { %322 = vmatprep.subr.msk.bf16.mxu0 %vm69_vm0, %v30_v2  ;;  %v77_v4 = vsel %vm69_vm0, %v30_v2, 0  ;;  %41 = vperm.xlu0 %325, %v35_v3  }
   0x5   :  { %309 = vmatpush3.bf16.xpose.msra.mxu0 %v77_v4 }
   0x6   :  { %13 = vsyncpa [#allocation4], 0  ;;  %v138_v10 = vld [vmem:[%s473_s4] sm:$0xff]  ;;  %56 = vperm.xlu1 %326, %v38_v9   ;;  %v139_v11 = vld [vmem:[%s473_s4 + $0x8] sm:$0xff]  ;;  %vm172_vm1 = vcmask 261120   ;;  %vm260_vm2 = vcmask 31744  }
   0x7   :  { %v140_v12 = vld [vmem:[%s473_s4 + $0x10] sm:$0xff]  ;;  %v141_v13 = vld [vmem:[%s473_s4 + $0x18] sm:$0xff]  ;;  %v232_v14 = vld [vmem:[%s474_s5] sm:$0xff]  ;;  %s356_s0 = smov [#allocation3]   ;;  %vm277_vm3 = vcmask 24576  }
   0x8   :  { %46 = vperm.xlu0 %325, %v36_v8   ;;  %v233_v15 = vld [vmem:[%s474_s5 + $0x8] sm:$0xff]  ;;  %v234_v16 = vld [vmem:[%s474_s5 + $0x10] sm:$0xff]  ;;  %v235_v17 = vld [vmem:[%s474_s5 + $0x18] sm:$0xff]  ;;  %s285_s8 = sshll.u32 %s356_s0, 4  ;;  %s286_s8 = int_to_ptr.vmem [resolvable:$true] %s285_s8 }
   0x9   :  { %v329_v18 = vld [vmem:[%s472_s3] sm:$0xff]   ;;  %v330_v37 = vld [vmem:[%s472_s3 + $0x8] sm:$0xff]   ;;  %s331_s9 = scalar_lea.vmem %s286_s8, 16  ;;  %s335_s10 = scalar_lea.vmem %s286_s8, 32 }
   0xa   :  { %149 = vperm.xlu1 %326, %v139_v11   ;;  %318 = vmatprep.mubr.msk.bf16.mxu1 %vm172_vm1, %v329_v18  ;;  %p332_p0 = scmp.ne.s32.totalorder %s286_s8, %s331_s9  ;;  %p336_p1 = scmp.lt.s32.totalorder %s286_s8, %s286_s8 }
   0xb   :  { %p337_p2 = scmp.lt.s32.totalorder %s335_s10, %s331_s9 }
   0xc   :  { %311 = vmatmul.mubr.msk.bf16.vlgmr.msra.gmra.mrb[0].mxu0 %vm69_vm0, %v328_v7  ;;  %144 = vperm.xlu0 %325, %v138_v10   ;;  %v275_v10 = vstv %s475_s6 }
   0xd   :  { %p338_p3 = por %p337_p2, %p336_p1 }
   0xe   :  { %159 = vperm.xlu1 %326, %v141_v13  }
   0xf   :  { %p339_p4 = pnand %p338_p3, %p332_p0 }
  0x10   :  { %154 = vperm.xlu0 %325, %v140_v12  }
  0x12   :  { %243 = vperm.xlu1 %326, %v233_v15  }
  0x14   :  { %238 = vperm.xlu0 %325, %v232_v14  }
  0x16   :  { %253 = vperm.xlu1 %326, %v235_v17  }
  0x18   :  { %248 = vperm.xlu0 %325, %v234_v16  }
  0x81   :  { %v52_v19 = vpop.permute.xlu1 %51 }
  0x83   :  { %v42_v20 = vpop.permute.xlu0 %41 }
  0x85   :  { %v57_v24 = vpop.permute.xlu1 %56 }
  0x87   :  { %v47_v27 = vpop.permute.xlu0 %46 }
  0x89   :  { %v150_v39 = vpop.permute.xlu1 %149 }
  0x8b   :  { %v145_v38 = vpop.permute.xlu0 %144 }
  0x8d   :  { %v160_v41 = vpop.permute.xlu1 %159 }
  0x8f   :  { %v155_v40 = vpop.permute.xlu0 %154 }
  0x91   :  { %v244_v48 = vpop.permute.xlu1 %243 }
  0x93   :  { %v239_v43 = vpop.permute.xlu0 %238 }
  0x95   :  { %v254_v60 = vpop.permute.xlu1 %253 }
  0x97   :  { %v249_v57 = vpop.permute.xlu0 %248 }
  0xdf   :  { %v312_v21 = vpop.f32.mrb[0].mxu0 }
  0xe0   :  { %v122_v22 = vadd.f32 %v312_v21, %v52_v19  ;;  %v113_v23 = vpop.f32.mrb[1].mxu0 }
  0xe1   :  { %v114_v25 = vadd.f32 %v113_v23, %v42_v20  ;;  %v313_v26 = vpop.f32.mrb[2].mxu0 }
  0xe2   :  { %v125_v28 = vadd.f32 %v313_v26, %v57_v24  ;;  %v116_v29 = vpop.f32.mrb[3].mxu0  ;;  %v130_v31 = vmax.f32 %v122_v22, 0.0 }
  0xe3   :  { %v117_v30 = vadd.f32 %v116_v29, %v47_v27  ;;  %v128_v33 = vmax.f32 %v114_v25, 0.0 }
  0xe4   :  { %v131_v32 = vmax.f32 %v125_v28, 0.0 }
  0xe5   :  { %v129_v34 = vmax.f32 %v117_v30, 0.0 }
  0xe6   :  { %v137_v35 = vpack.c.bf16 %v131_v32, %v130_v31 }
  0xe7   :  { %v136_v36 = vpack.c.bf16 %v129_v34, %v128_v33 }
  0xe9   :  { %314 = vmatprep.subr.bf16.mxu1 %v136_v36 }
  0xea   :  { %315 = vmatpush3.bf16.msra.mxu1 %v136_v36 }
  0xeb   :  { %316 = vmatprep.subr.bf16.mxu1 %v137_v35 }
  0xee   :  { %317 = vmatpush3.bf16.msra.mxu1 %v137_v35 }
  0xf1   :  { %319 = vmatmul.mubr.msk.bf16.vlgmr.msra.gmra.mrb[0].mxu1 %vm172_vm1, %v330_v37 }
 0x1c4   :  { %v320_v42 = vpop.f32.mrb[0].mxu1 }
 0x1c5   :  { %v222_v44 = vadd.f32 %v320_v42, %v155_v40  ;;  %v213_v45 = vpop.f32.mrb[1].mxu1 }
 0x1c6   :  { %v214_v46 = vadd.f32 %v213_v45, %v145_v38  ;;  %v321_v47 = vpop.f32.mrb[2].mxu1 }
 0x1c7   :  { %v225_v49 = vadd.f32 %v321_v47, %v160_v41  ;;  %v216_v50 = vpop.f32.mrb[3].mxu1  ;;  %v230_v51 = vmax.f32 %v222_v44, 0.0 }
 0x1c8   :  { %v228_v52 = vmax.f32 %v214_v46, 0.0  ;;  %v217_v53 = vadd.f32 %v216_v50, %v150_v39 }
 0x1c9   :  { %v231_v55 = vmax.f32 %v225_v49, 0.0  ;;  %v258_v58 = vmul.f32 %v249_v57, %v230_v51 }
 0x1ca   :  { %v256_v54 = vmul.f32 %v239_v43, %v228_v52  ;;  %v229_v56 = vmax.f32 %v217_v53, 0.0 }
 0x1cb   :  { %v259_v62 = vmul.f32 %v254_v60, %v231_v55  ;;  %v264_v1 = vsel %vm260_vm2, %v258_v58, 0.0 }
 0x1cc   :  { %v257_v59 = vmul.f32 %v244_v48, %v229_v56  ;;  %v261_v61 = vsel %vm260_vm2, %v256_v54, 0.0 }
 0x1cd   :  { %v266_v3 = vsel %vm260_vm2, %v259_v62, 0.0 }
 0x1ce   :  { %v262_v63 = vsel %vm260_vm2, %v257_v59, 0.0 }
 0x1cf   :  { %v263_v0 = vadd.f32 %v262_v63, %v261_v61 }
 0x1d1   :  { %v265_v2 = vadd.f32 %v264_v1, %v263_v0 }
 0x1d3   :  { %v267_v4 = vadd.f32 %v266_v3, %v265_v2 }
 0x1d5   :  { %v268_v5 = vrot.slane %v267_v4, 4 }
 0x1d7   :  { %v269_v6 = vadd.f32 %v268_v5, %v267_v4 }
 0x1d9   :  { %v270_v7 = vrot.slane %v269_v6, 2 }
 0x1db   :  { %v271_v8 = vadd.f32 %v270_v7, %v269_v6 }
 0x1dd   :  { %v272_v9 = vrot.slane %v271_v8, 1 }
 0x1df   :  { %v273_v11 = vadd.f32 %v272_v9, %v271_v8 }
 0x1e1   :  { %v276_v12 = vadd.f32 %v275_v10, %v273_v11 }
 0x1e3   :  { %278 = vst.msk [vmem:[#allocation3] sm:$0x1] %vm277_vm3, %v276_v12 }
 0x1e4   :  { %342 = shalt.err (!%p339_p4)
}
 0x1e5   :  { %s343_s13 = scalar_lea.hbm %s476_s7, 16 }
 0x1e6   :  { %p344_p5 = scmp.ne.s32.totalorder %s476_s7, %s343_s13  ;;  %p347_p6 = scmp.lt.u32.totalorder %s343_s13, %s476_s7 }
 0x1e8   :  { %p349_p7 = pnand %p347_p6, %p344_p5 }
 0x1ea   :  { %352 = shalt.err (!%p349_p7)
}
 0x1eb   :  { %288 = dma.vmem_to_hbm [thread:$0]  %s286_s8, 16, %s476_s7, [#allocation4]  }
 0x1ec   :  { %353 = dma.done.wait [#allocation4], 16  }
 0x1ed   :  { %354 = vsyncadd [#allocation4], 4294967280 }
 0x1ee   :  { %292 = vsyncpa [#allocation4], 1 }

</bundles_post_ra>
